<compile_context>
chip_gen: v6e
topology: v6e:2x2x1
jax: 0.10.0
libtpu: 0.0.40
codegen_flags: <defaults>
</compile_context>

<pallas_src>
import functools

import jax
import jax.numpy as jnp
from jax import lax
from jax.experimental import pallas as pl
from jax.experimental.pallas import tpu as pltpu


def _round_up(x: int, m: int) -> int:
    return ((x + m - 1) // m) * m


def _num_tensorcores() -> int:
    """Best-effort TensorCores-per-chip (2 on v7x, 1 on v5e/v6e). Never raises."""
    try:
        info = pltpu.get_tpu_info()
        for attr in ("num_cores", "num_tensorcores", "tensorcore_count", "cores_per_chip"):
            n = getattr(info, attr, None)
            if isinstance(n, int) and n > 0:
                return n
    except Exception:
        pass
    try:
        kind = jax.devices()[0].device_kind.lower()
        if "v7" in kind:
            return 2
    except Exception:
        pass
    return 1


def _visual_extractor_kernel(x_ref, w_ref, patch_ref, pavg_ref, *,
                             batch_pad, rows_per_batch, valid_rows):
    # x_ref:     (bm, K_pad)        row tile of im2col'd images (zero-padded rows/lanes)
    # w_ref:     (K_pad, F_pad)     conv weight as a resident matmul operand
    # patch_ref: (bm, F_pad)        per-position features for this row tile
    # pavg_ref:  (1, B_pad, F_pad)  this tile's partial AvgPool2d(7) contribution
    bm = x_ref.shape[0]

    # Hot path: conv-as-matmul on the MXU, f32 accumulation regardless of operand dtype.
    feats = jnp.dot(x_ref[...], w_ref[...], preferred_element_type=jnp.float32)
    patch_ref[...] = feats.astype(patch_ref.dtype)

    # Pool mask generated in-kernel (no extra HBM input / DMA):
    # pool[b, r] = 1/P iff global row (i*bm + r) belongs to batch element b and is real.
    row0 = pl.program_id(0) * bm
    r = row0 + lax.broadcasted_iota(jnp.int32, (batch_pad, bm), 1)   # lane axis: rows
    b = lax.broadcasted_iota(jnp.int32, (batch_pad, bm), 0)          # sublane axis: batch
    in_batch = (r >= b * rows_per_batch) & (r < (b + 1) * rows_per_batch) & (r < valid_rows)
    pool = jnp.where(in_batch, jnp.float32(1.0 / rows_per_batch), jnp.float32(0.0))

    # Partial AvgPool2d(7) as a standard-orientation (B_pad, bm) x (bm, F_pad) MXU matmul.
    pavg = jnp.dot(pool, feats, preferred_element_type=jnp.float32)  # (B_pad, F_pad)
    pavg_ref[...] = pavg[None].astype(pavg_ref.dtype)


def visual_extractor_forward(images, conv_w):
    """images: (B, C, H, W) float32 (NCHW, like PyTorch); conv_w: (F, C, kh, kw)."""
    B, C, H, W = images.shape
    F, _, kh, kw = conv_w.shape
    Hp, Wp = H // kh, W // kw             # patchify: stride == kernel
    P = Hp * Wp                           # 49 feature positions (7x7)
    K = C * kh * kw
    M = B * P                             # batch folded into the flattened row axis

    # ---- wrapper-side im2col (single small permute over the image tensor) ----
    x_cols = images.reshape(B, C, Hp, kh, Wp, kw)
    x_cols = jnp.transpose(x_cols, (0, 2, 4, 1, 3, 5)).reshape(M, K)  # rows: (b, hp, wp)
    w_mat = conv_w.reshape(F, K).T.astype(jnp.float32)                # (K, F), cols: (c, dh, dw)

    # ---- TPU-friendly padding / dtype choices ----
    use_bf16 = (K >= 256) and (F >= 512)             # only pays off at real backbone dims
    F_pad = _round_up(F, 128)                        # lane-dense outputs (unmasked vst)
    K_pad = _round_up(K, 256 if use_bf16 else 128)   # lane-dense LHS, aligned weight loads
    B_pad = _round_up(B, 8)                          # full-sublane pooled result / stores

    # Row tiling: one tile on single-TensorCore chips (v5e/v6e); >=2 "parallel" tiles on
    # v7x so both TensorCores get work. Cap at 512 rows per tile (roofline sweet spot).
    tiles = 2 if (_num_tensorcores() >= 2 and M > 16) else 1
    sub = 16 if use_bf16 else 8                      # clean sublane packing for bf16
    bm = min(_round_up(pl.cdiv(M, tiles), sub), 512)
    grid_m = pl.cdiv(M, bm)
    M_pad = grid_m * bm

    x_cols = jnp.pad(x_cols, ((0, M_pad - M), (0, K_pad - K)))
    w_mat = jnp.pad(w_mat, ((0, K_pad - K), (0, F_pad - F)))
    if use_bf16:
        x_cols = x_cols.astype(jnp.bfloat16)
        w_mat = w_mat.astype(jnp.bfloat16)

    itemsize = jnp.dtype(x_cols.dtype).itemsize
    flops = 2 * M_pad * K_pad * F_pad + 2 * M_pad * B_pad * F_pad
    bytes_accessed = (itemsize * (M_pad * K_pad + K_pad * F_pad)
                      + 4 * (M_pad * F_pad + grid_m * B_pad * F_pad))

    kernel = functools.partial(
        _visual_extractor_kernel,
        batch_pad=B_pad, rows_per_batch=P, valid_rows=M)

    # TODO(synk): with real backbone dims on v7x (64 MiB VMEM), single-buffer the
    # resident weight (pipeline_mode=pl.Buffered(1)) or add an F-tiling grid axis and
    # raise vmem_limit_bytes via pltpu.CompilerParams.
    patch_pad, pavg = pl.pallas_call(
        kernel,
        out_shape=(
            jax.ShapeDtypeStruct((M_pad, F_pad), jnp.float32),
            jax.ShapeDtypeStruct((grid_m, B_pad, F_pad), jnp.float32),
        ),
        grid_spec=pltpu.PrefetchScalarGridSpec(
            num_scalar_prefetch=0,
            grid=(grid_m,),
            in_specs=[
                pl.BlockSpec((bm, K_pad), lambda i: (i, 0)),      # im2col row tile
                pl.BlockSpec((K_pad, F_pad), lambda i: (0, 0)),   # weight stays resident
            ],
            out_specs=[
                pl.BlockSpec((bm, F_pad), lambda i: (i, 0)),
                pl.BlockSpec((1, B_pad, F_pad), lambda i: (i, 0, 0)),
            ],
        ),
        compiler_params=pltpu.CompilerParams(
            dimension_semantics=("parallel",),
        ),
        cost_estimate=pl.CostEstimate(
            flops=flops, transcendentals=0, bytes_accessed=bytes_accessed),
    )(x_cols, w_mat)

    # Un-pad: matches patch_feats (B, H'*W', C_feat) and avg_feats (B, C_feat).
    patch_feats = patch_pad[:M, :F].reshape(B, P, F)
    avg_pad = pavg[0] if grid_m == 1 else pavg.sum(axis=0)   # static branch; no reduce at grid_m==1
    avg_feats = avg_pad[:B, :F]
    return patch_feats, avg_feats


if __name__ == "__main__":
    key = jax.random.PRNGKey(0)
    k_img, k_w = jax.random.split(key)

    B, C, H, W = 2, 3, 14, 14          # small NCHW images -> 7x7 feature grid
    F = 32                             # synthetic backbone feature channels
    images = jax.random.normal(k_img, (B, C, H, W), dtype=jnp.float32)
    conv_w = jax.random.normal(k_w, (F, C, 2, 2), dtype=jnp.float32) * 0.1

    fwd = jax.jit(visual_extractor_forward)
    patch_feats, avg_feats = fwd(images, conv_w)
    jax.block_until_ready((patch_feats, avg_feats))

    # plain-JAX reference for sanity
    Hp, Wp = H // 2, W // 2
    x_cols = jnp.transpose(
        images.reshape(B, C, Hp, 2, Wp, 2), (0, 2, 4, 1, 3, 5)
    ).reshape(B, Hp * Wp, C * 4)
    feats_ref = jnp.einsum("bpk,kf->bpf", x_cols, conv_w.reshape(F, -1).T)
    avg_ref = feats_ref.mean(axis=1)

    assert patch_feats.shape == (B, Hp * Wp, F)
    assert avg_feats.shape == (B, F)
    assert jnp.allclose(patch_feats, feats_ref, atol=1e-4, rtol=1e-4)
    assert jnp.allclose(avg_feats, avg_ref, atol=1e-4, rtol=1e-4)

    print("KERNEL_OK")
</pallas_src>

<mosaic_0001>
module attributes {stable_mosaic.version = 11 : i64} {
  func.func @_visual_extractor_kernel(%arg0: i32, %arg1: memref<104x128xf32, #tpu.memory_space<vmem>>, %arg2: memref<128x128xf32, #tpu.memory_space<vmem>>, %arg3: memref<104x128xf32, #tpu.memory_space<vmem>>, %arg4: memref<1x8x128xf32, #tpu.memory_space<vmem>>) attributes {dimension_semantics = [#tpu.dimension_semantics<parallel>], iteration_bounds = array<i64: 1>, scalar_prefetch = 0 : i64, scratch_operands = 0 : i64, tpu.core_type = #tpu.core_type<tc>, window_params = [{transform_indices = @transform_0, window_bounds = array<i64: 104, 128>}, {pipeline_mode = #tpu.pipeline_mode<synchronous>, transform_indices = @transform_1, window_bounds = array<i64: 128, 128>}, {transform_indices = @transform_2, window_bounds = array<i64: 104, 128>}, {transform_indices = @transform_3, window_bounds = array<i64: 1, 8, 128>}]} {
    %c0 = arith.constant 0 : index
    %c0_0 = arith.constant 0 : index
    %0 = vector.load %arg1[%c0, %c0_0] : memref<104x128xf32, #tpu.memory_space<vmem>>, vector<104x128xf32>
    %c0_1 = arith.constant 0 : index
    %c0_2 = arith.constant 0 : index
    %1 = vector.load %arg2[%c0_1, %c0_2] : memref<128x128xf32, #tpu.memory_space<vmem>>, vector<128x128xf32>
    %cst = arith.constant dense<0.000000e+00> : vector<104x128xf32>
    %2 = tpu.matmul %0, %1, %cst {dimension_numbers = #tpu.dot_dimension_numbers<[1], [0], [0], [1], [0, 0, 1, 1], [], []>} : vector<104x128xf32>, vector<128x128xf32>, vector<104x128xf32> -> vector<104x128xf32>
    %c0_3 = arith.constant 0 : index
    %c0_4 = arith.constant 0 : index
    %3 = vector.load %arg3[%c0_3, %c0_4] : memref<104x128xf32, #tpu.memory_space<vmem>>, vector<104x128xf32>
    tpu.vector_store %arg3[%c0_3, %c0_4], %2 {strides = array<i32>} : memref<104x128xf32, #tpu.memory_space<vmem>>, vector<104x128xf32>,
    %c104_i32 = arith.constant 104 : i32
    %4 = arith.muli %arg0, %c104_i32 : i32
    %5 = tpu.iota {dimensions = array<i32: 1>} : vector<8x104xi32>
    %6 = vector.broadcast %4 : i32 to vector<8x104xi32>
    %7 = arith.addi %6, %5 : vector<8x104xi32>
    %8 = tpu.iota {dimensions = array<i32: 0>} : vector<8x104xi32>
    %c49_i32 = arith.constant 49 : i32
    %9 = vector.broadcast %c49_i32 : i32 to vector<8x104xi32>
    %10 = arith.muli %8, %9 : vector<8x104xi32>
    %11 = arith.cmpi sge, %7, %10 : vector<8x104xi32>
    %c1_i32 = arith.constant 1 : i32
    %12 = vector.broadcast %c1_i32 : i32 to vector<8x104xi32>
    %13 = arith.addi %8, %12 : vector<8x104xi32>
    %c49_i32_5 = arith.constant 49 : i32
    %14 = vector.broadcast %c49_i32_5 : i32 to vector<8x104xi32>
    %15 = arith.muli %13, %14 : vector<8x104xi32>
    %16 = arith.cmpi slt, %7, %15 : vector<8x104xi32>
    %17 = arith.andi %11, %16 : vector<8x104xi1>
    %c98_i32 = arith.constant 98 : i32
    %18 = vector.broadcast %c98_i32 : i32 to vector<8x104xi32>
    %19 = arith.cmpi slt, %7, %18 : vector<8x104xi32>
    %20 = arith.andi %17, %19 : vector<8x104xi1>
    %cst_6 = arith.constant 0.0204081628 : f32
    %cst_7 = arith.constant 0.000000e+00 : f32
    %21 = vector.broadcast %cst_6 : f32 to vector<8x104xf32>
    %22 = vector.broadcast %cst_7 : f32 to vector<8x104xf32>
    %23 = arith.select %20, %21, %22 : vector<8x104xi1>, vector<8x104xf32>
    %cst_8 = arith.constant dense<0.000000e+00> : vector<8x128xf32>
    %24 = tpu.matmul %23, %2, %cst_8 {dimension_numbers = #tpu.dot_dimension_numbers<[1], [0], [0], [1], [0, 0, 1, 1], [], []>} : vector<8x104xf32>, vector<104x128xf32>, vector<8x128xf32> -> vector<8x128xf32>
    %25 = vector.shape_cast %24 : vector<8x128xf32> to vector<1x8x128xf32>
    %c0_9 = arith.constant 0 : index
    %c0_10 = arith.constant 0 : index
    %c0_11 = arith.constant 0 : index
    %26 = vector.load %arg4[%c0_9, %c0_10, %c0_11] : memref<1x8x128xf32, #tpu.memory_space<vmem>>, vector<1x8x128xf32>
    tpu.vector_store %arg4[%c0_9, %c0_10, %c0_11], %25 {strides = array<i32>} : memref<1x8x128xf32, #tpu.memory_space<vmem>>, vector<1x8x128xf32>,
    return
  }
  func.func @transform_0(%arg0: i32) -> (i32, i32) {
    %c0_i32 = arith.constant 0 : i32
    %c0_i32_0 = arith.constant 0 : i32
    return %arg0, %c0_i32 : i32, i32
  }
  func.func @transform_1(%arg0: i32) -> (i32, i32) {
    %c0_i32 = arith.constant 0 : i32
    %c0_i32_0 = arith.constant 0 : i32
    %c0_i32_1 = arith.constant 0 : i32
    return %c0_i32, %c0_i32_0 : i32, i32
  }
  func.func @transform_2(%arg0: i32) -> (i32, i32) {
    %c0_i32 = arith.constant 0 : i32
    %c0_i32_0 = arith.constant 0 : i32
    return %arg0, %c0_i32 : i32, i32
  }
  func.func @transform_3(%arg0: i32) -> (i32, i32, i32) {
    %c0_i32 = arith.constant 0 : i32
    %c0_i32_0 = arith.constant 0 : i32
    %c0_i32_1 = arith.constant 0 : i32
    return %arg0, %c0_i32, %c0_i32_0 : i32, i32, i32
  }
}

</mosaic_0001>

<bundles_post_ra>
// kernel: visual_extractor_forward.1
= control target key start
LH: loop header
LB: loop body
LE: loop exit
PB: predicated region body
PF: predicated region fallthrough
CT: control target
= control target key end

     0   :  { %v430_v0 = vmov 0.0   ;;  %vm431_vm0 = vmmov 0   ;;  %v186_v54 = vlaneseq  ;;  %vm201_vm6 = vcmask 850944   ;;  %s651_s1 = inlined_call_operand.vmem [shape: f32[128,128], index: 1, kind: input, shape index: {}]   ;;  %s652_s0 = inlined_call_operand.vmem [shape: f32[104,128], index: 0, kind: input, shape index: {}]   ;;  %s653_s2 = inlined_call_operand.vmem [shape: f32[104,128], index: 2, kind: output, shape index: {0}]   ;;  %s654_s3 = inlined_call_operand.vmem [shape: f32[1,8,128], index: 3, kind: output, shape index: {1}]  }
   0x1   :  { %328 = vmatprep.subr.mxu0 %v430_v0  ;;  %v41_v1 = vld [vmem:[%s651_s1 + $0x78] sm:$0xff]  ;;  %v40_v2 = vld [vmem:[%s651_s1 + $0x70] sm:$0xff]  ;;  %360 = vmatprep.mubr.msk.f32.mxu0 %vm431_vm0, %v430_v0  ;;  %v39_v3 = vld [vmem:[%s651_s1 + $0x68] sm:$0xff] }
   0x2   :  { %329 = vmatpush3.msra.mxu0 %v41_v1  ;;  %399 = vmatprep.subr.mxu1 %v430_v0  ;;  %v38_v4 = vld [vmem:[%s651_s1 + $0x60] sm:$0xff]  ;;  %v37_v5 = vld [vmem:[%s651_s1 + $0x58] sm:$0xff]  ;;  %v36_v6 = vld [vmem:[%s651_s1 + $0x50] sm:$0xff]  ;;  %v191_v57 = vshrl.u32 %v186_v54, 7  ;;  %v187_v59 = vand.u32 127, %v186_v54 }
   0x3   :  { %330 = vmatprep.subr.mxu0 %v430_v0  ;;  %425 = vmatprep.mubr.msk.f32.mxu1 %vm431_vm0, %v430_v0  ;;  %v35_v7 = vld [vmem:[%s651_s1 + $0x48] sm:$0xff]  ;;  %v34_v8 = vld [vmem:[%s651_s1 + $0x40] sm:$0xff]  ;;  %v33_v9 = vld [vmem:[%s651_s1 + $0x38] sm:$0xff] }
   0x4   :  { %331 = vmatpush3.msra.mxu0 %v40_v2  ;;  %v32_v10 = vld [vmem:[%s651_s1 + $0x30] sm:$0xff]  ;;  %v31_v11 = vld [vmem:[%s651_s1 + $0x28] sm:$0xff]  ;;  %v30_v12 = vld [vmem:[%s651_s1 + $0x20] sm:$0xff]  ;;  %v194_v58 = vadd.s32 1, %v191_v57  ;;  %v192_v60 = vmul.u32 49, %v191_v57  ;;  %vm198_vm4 = vcmp.lt.s32.totalorder %v187_v59, 98 }
   0x5   :  { %332 = vmatprep.subr.mxu0 %v430_v0  ;;  %v29_v13 = vld [vmem:[%s651_s1 + $0x18] sm:$0xff]  ;;  %v28_v14 = vld [vmem:[%s651_s1 + $0x10] sm:$0xff]  ;;  %v27_v15 = vld [vmem:[%s651_s1 + $0x8] sm:$0xff] }
   0x6   :  { %333 = vmatpush3.msra.mxu0 %v39_v3  ;;  %v26_v16 = vld [vmem:[%s651_s1] sm:$0xff]  ;;  %v14_v18 = vld [vmem:[%s652_s0 + $0x8] sm:$0xff]  ;;  %v15_v19 = vld [vmem:[%s652_s0 + $0x10] sm:$0xff]  ;;  %v195_v61 = vmul.u32 49, %v194_v58  ;;  %vm193_vm1 = vcmp.ge.s32.totalorder %v187_v59, %v192_v60 }
   0x7   :  { %334 = vmatprep.subr.mxu0 %v430_v0  ;;  %v13_v17 = vld [vmem:[%s652_s0] sm:$0xff]  ;;  %v16_v20 = vld [vmem:[%s652_s0 + $0x18] sm:$0xff]  ;;  %v18_v22 = vld [vmem:[%s652_s0 + $0x28] sm:$0xff] }
   0x8   :  { %335 = vmatpush3.msra.mxu0 %v38_v4  ;;  %v17_v21 = vld [vmem:[%s652_s0 + $0x20] sm:$0xff]  ;;  %v19_v23 = vld [vmem:[%s652_s0 + $0x30] sm:$0xff]  ;;  %v20_v24 = vld [vmem:[%s652_s0 + $0x38] sm:$0xff]  ;;  %vm196_vm2 = vcmp.lt.s32.totalorder %v187_v59, %v195_v61 }
   0x9   :  { %336 = vmatprep.subr.mxu0 %v430_v0  ;;  %v21_v25 = vld [vmem:[%s652_s0 + $0x40] sm:$0xff]  ;;  %v22_v26 = vld [vmem:[%s652_s0 + $0x48] sm:$0xff]  ;;  %v23_v27 = vld [vmem:[%s652_s0 + $0x50] sm:$0xff] }
   0xa   :  { %337 = vmatpush3.msra.mxu0 %v37_v5  ;;  %v24_v28 = vld [vmem:[%s652_s0 + $0x58] sm:$0xff]  ;;  %v25_v29 = vld [vmem:[%s652_s0 + $0x60] sm:$0xff]  ;;  %vm197_vm3 = vmand %vm193_vm1, %vm196_vm2 }
   0xb   :  { %338 = vmatprep.subr.mxu0 %v430_v0  ;;  %vm199_vm5 = vmand %vm197_vm3, %vm198_vm4 }
   0xc   :  { %339 = vmatpush3.msra.mxu0 %v36_v6  ;;  %v200_v62 = vsel %vm199_vm5, 0.020408163, %v430_v0 }
   0xd   :  { %340 = vmatprep.subr.mxu0 %v430_v0 }
   0xe   :  { %341 = vmatpush3.msra.mxu0 %v35_v7 }
   0xf   :  { %342 = vmatprep.subr.mxu0 %v430_v0 }
  0x10   :  { %343 = vmatpush3.msra.mxu0 %v34_v8 }
  0x11   :  { %344 = vmatprep.subr.mxu0 %v430_v0 }
  0x12   :  { %345 = vmatpush3.msra.mxu0 %v33_v9 }
  0x13   :  { %346 = vmatprep.subr.mxu0 %v430_v0 }
  0x14   :  { %347 = vmatpush3.msra.mxu0 %v32_v10 }
  0x15   :  { %348 = vmatprep.subr.mxu0 %v430_v0 }
  0x16   :  { %349 = vmatpush3.msra.mxu0 %v31_v11 }
  0x17   :  { %350 = vmatprep.subr.mxu0 %v430_v0 }
  0x18   :  { %351 = vmatpush3.msra.mxu0 %v30_v12 }
  0x19   :  { %352 = vmatprep.subr.mxu0 %v430_v0 }
  0x1a   :  { %353 = vmatpush3.msra.mxu0 %v29_v13 }
  0x1b   :  { %354 = vmatprep.subr.mxu0 %v430_v0 }
  0x1c   :  { %355 = vmatpush3.msra.mxu0 %v28_v14 }
  0x1d   :  { %356 = vmatprep.subr.mxu0 %v430_v0 }
  0x1e   :  { %357 = vmatpush3.msra.mxu0 %v27_v15 }
  0x1f   :  { %358 = vmatprep.subr.mxu0 %v430_v0 }
  0x20   :  { %359 = vmatpush3.msra.mxu0 %v26_v16 }
  0x21   :  { %361 = vmatmul.mubr.f32.vlgmr.msra.gmra.mxu0 %v13_v17 }
  0x22   :  { %363 = vmatprep.mubr.msk.f32.mxu0 %vm431_vm0, %v430_v0 }
  0x25   :  { %364 = vmatmul.mubr.f32.gmra.mxu0 %v14_v18 }
  0x26   :  { %366 = vmatprep.mubr.msk.f32.mxu0 %vm431_vm0, %v430_v0 }
  0x29   :  { %367 = vmatmul.mubr.f32.gmra.mxu0 %v15_v19 }
  0x2a   :  { %369 = vmatprep.mubr.msk.f32.mxu0 %vm431_vm0, %v430_v0 }
  0x2d   :  { %370 = vmatmul.mubr.f32.gmra.mxu0 %v16_v20 }
  0x2e   :  { %372 = vmatprep.mubr.msk.f32.mxu0 %vm431_vm0, %v430_v0 }
  0x31   :  { %373 = vmatmul.mubr.f32.gmra.mxu0 %v17_v21 }
  0x32   :  { %375 = vmatprep.mubr.msk.f32.mxu0 %vm431_vm0, %v430_v0 }
  0x35   :  { %376 = vmatmul.mubr.f32.gmra.mxu0 %v18_v22 }
  0x36   :  { %378 = vmatprep.mubr.msk.f32.mxu0 %vm431_vm0, %v430_v0 }
  0x39   :  { %379 = vmatmul.mubr.f32.gmra.mxu0 %v19_v23 }
  0x3a   :  { %381 = vmatprep.mubr.msk.f32.mxu0 %vm431_vm0, %v430_v0 }
  0x3d   :  { %382 = vmatmul.mubr.f32.gmra.mxu0 %v20_v24 }
  0x3e   :  { %384 = vmatprep.mubr.msk.f32.mxu0 %vm431_vm0, %v430_v0 }
  0x41   :  { %385 = vmatmul.mubr.f32.gmra.mxu0 %v21_v25 }
  0x42   :  { %387 = vmatprep.mubr.msk.f32.mxu0 %vm431_vm0, %v430_v0 }
  0x45   :  { %388 = vmatmul.mubr.f32.gmra.mxu0 %v22_v26 }
  0x46   :  { %390 = vmatprep.mubr.msk.f32.mxu0 %vm431_vm0, %v430_v0 }
  0x49   :  { %391 = vmatmul.mubr.f32.gmra.mxu0 %v23_v27 }
  0x4a   :  { %393 = vmatprep.mubr.msk.f32.mxu0 %vm431_vm0, %v430_v0 }
  0x4d   :  { %394 = vmatmul.mubr.f32.gmra.mxu0 %v24_v28 }
  0x4e   :  { %396 = vmatprep.mubr.msk.f32.mxu0 %vm431_vm0, %v430_v0 }
  0x51   :  { %397 = vmatmul.mubr.f32.gmra.mxu0 %v25_v29 }
  0xe1   :  { %v584_v30 = vpop.f32.mrf.mxu0 }
  0xe2   :  { %172 = vst [vmem:[%s653_s2] sm:$0xff] %v584_v30 }
  0xe3   :  { %v362_v31 = vpop.f32.mrf.mxu0 }
  0xe5   :  { %v590_v32 = vpop.f32.mrf.mxu0 }
  0xe6   :  { %173 = vst [vmem:[%s653_s2 + $0x8] sm:$0xff] %v590_v32 }
  0xe7   :  { %v365_v33 = vpop.f32.mrf.mxu0 }
  0xe9   :  { %v596_v34 = vpop.f32.mrf.mxu0 }
  0xea   :  { %174 = vst [vmem:[%s653_s2 + $0x10] sm:$0xff] %v596_v34 }
  0xeb   :  { %v368_v35 = vpop.f32.mrf.mxu0 }
  0xed   :  { %v123_v36 = vpop.f32.mrf.mxu0 }
  0xee   :  { %175 = vst [vmem:[%s653_s2 + $0x18] sm:$0xff] %v123_v36 }
  0xef   :  { %v371_v37 = vpop.f32.mrf.mxu0 }
  0xf1   :  { %v128_v38 = vpop.f32.mrf.mxu0 }
  0xf2   :  { %176 = vst [vmem:[%s653_s2 + $0x20] sm:$0xff] %v128_v38 }
  0xf3   :  { %v374_v39 = vpop.f32.mrf.mxu0 }
  0xf5   :  { %v133_v40 = vpop.f32.mrf.mxu0 }
  0xf6   :  { %177 = vst [vmem:[%s653_s2 + $0x28] sm:$0xff] %v133_v40 }
  0xf7   :  { %v377_v41 = vpop.f32.mrf.mxu0 }
  0xf9   :  { %v138_v42 = vpop.f32.mrf.mxu0 }
  0xfa   :  { %178 = vst [vmem:[%s653_s2 + $0x30] sm:$0xff] %v138_v42 }
  0xfb   :  { %v380_v43 = vpop.f32.mrf.mxu0 }
  0xfd   :  { %v143_v44 = vpop.f32.mrf.mxu0 }
  0xfe   :  { %179 = vst [vmem:[%s653_s2 + $0x38] sm:$0xff] %v143_v44 }
  0xff   :  { %v383_v45 = vpop.f32.mrf.mxu0 }
 0x101   :  { %v148_v46 = vpop.f32.mrf.mxu0 }
 0x102   :  { %180 = vst [vmem:[%s653_s2 + $0x40] sm:$0xff] %v148_v46 }
 0x103   :  { %v386_v47 = vpop.f32.mrf.mxu0 }
 0x105   :  { %v153_v48 = vpop.f32.mrf.mxu0 }
 0x106   :  { %181 = vst [vmem:[%s653_s2 + $0x48] sm:$0xff] %v153_v48 }
 0x107   :  { %v389_v49 = vpop.f32.mrf.mxu0 }
 0x109   :  { %v158_v50 = vpop.f32.mrf.mxu0 }
 0x10a   :  { %182 = vst [vmem:[%s653_s2 + $0x50] sm:$0xff] %v158_v50 }
 0x10b   :  { %v392_v51 = vpop.f32.mrf.mxu0 }
 0x10d   :  { %v163_v52 = vpop.f32.mrf.mxu0 }
 0x10e   :  { %183 = vst [vmem:[%s653_s2 + $0x58] sm:$0xff] %v163_v52 }
 0x10f   :  { %v395_v53 = vpop.f32.mrf.mxu0 }
 0x111   :  { %v168_v55 = vpop.f32.mrf.mxu0 }
 0x112   :  { %184 = vst [vmem:[%s653_s2 + $0x60] sm:$0xff] %v168_v55  ;;  %400 = vmatpush3.msra.mxu1 %v168_v55 }
 0x113   :  { %v398_v56 = vpop.f32.mrf.mxu0  ;;  %401 = vmatprep.subr.mxu1 %v430_v0 }
 0x114   :  { %402 = vmatpush3.msra.mxu1 %v163_v52 }
 0x115   :  { %403 = vmatprep.subr.mxu1 %v430_v0 }
 0x116   :  { %404 = vmatpush3.msra.mxu1 %v158_v50 }
 0x117   :  { %405 = vmatprep.subr.mxu1 %v430_v0 }
 0x118   :  { %406 = vmatpush3.msra.mxu1 %v153_v48 }
 0x119   :  { %407 = vmatprep.subr.mxu1 %v430_v0 }
 0x11a   :  { %408 = vmatpush3.msra.mxu1 %v148_v46 }
 0x11b   :  { %409 = vmatprep.subr.mxu1 %v430_v0 }
 0x11c   :  { %410 = vmatpush3.msra.mxu1 %v143_v44 }
 0x11d   :  { %411 = vmatprep.subr.mxu1 %v430_v0 }
 0x11e   :  { %412 = vmatpush3.msra.mxu1 %v138_v42 }
 0x11f   :  { %413 = vmatprep.subr.mxu1 %v430_v0 }
 0x120   :  { %414 = vmatpush3.msra.mxu1 %v133_v40 }
 0x121   :  { %415 = vmatprep.subr.mxu1 %v430_v0 }
 0x122   :  { %416 = vmatpush3.msra.mxu1 %v128_v38 }
 0x123   :  { %417 = vmatprep.subr.mxu1 %v430_v0 }
 0x124   :  { %418 = vmatpush3.msra.mxu1 %v123_v36 }
 0x125   :  { %419 = vmatprep.subr.mxu1 %v430_v0 }
 0x126   :  { %420 = vmatpush3.msra.mxu1 %v596_v34 }
 0x127   :  { %421 = vmatprep.subr.mxu1 %v430_v0 }
 0x128   :  { %422 = vmatpush3.msra.mxu1 %v590_v32 }
 0x129   :  { %423 = vmatprep.subr.mxu1 %v430_v0 }
 0x12a   :  { %424 = vmatpush3.msra.mxu1 %v584_v30 }
 0x12b   :  { %426 = vmatmul.mubr.msk.f32.vlgmr.msra.gmra.mxu1 %vm201_vm6, %v200_v62 }
 0x1eb   :  { %v271_v63 = vpop.f32.mrf.mxu1 }
 0x1ec   :  { %275 = vst [vmem:[%s654_s3] sm:$0xff] %v271_v63 }
 0x1ed   :  { %v427_v1 = vpop.f32.mrf.mxu1 }

</bundles_post_ra>
